<compile_context>
chip_gen: v7x
topology: tpu7x:2x2x1
jax: 0.10.0
libtpu: 0.0.40
codegen_flags: <defaults>
</compile_context>

<pallas_src>
import functools

import jax
import jax.numpy as jnp
from jax import lax
from jax.experimental import pallas as pl
from jax.experimental.pallas import tpu as pltpu

MAX_TOKENS_PER_BLOCK = 256   # tokens gathered per grid step
ONE_HOT_MAX_VOCAB = 4096     # use MXU one-hot gather below this vocab size


def _round_up(x, m):
    return ((x + m - 1) // m) * m


def _splitmix32(x):
    """Portable 32-bit finalizer hash on uint32 arrays (VPU int ops only)."""
    x = (x ^ (x >> jnp.uint32(16))) * jnp.uint32(0x7FEB352D)
    x = (x ^ (x >> jnp.uint32(15))) * jnp.uint32(0x846CA68B)
    x = x ^ (x >> jnp.uint32(16))
    return x


def _keep_mask_host(n_tokens, emb_dim, seed, dropout_p):
    """Pure-JAX reference of the in-kernel dropout mask (for testing)."""
    thr = min(int(round(dropout_p * 4294967296.0)), 4294967295)
    tok = jnp.arange(n_tokens, dtype=jnp.uint32)[:, None]
    col = jnp.arange(emb_dim, dtype=jnp.uint32)[None, :]
    x = tok * jnp.uint32(emb_dim) + col + jnp.uint32(seed) * jnp.uint32(0x9E3779B9)
    return _splitmix32(x) >= jnp.uint32(thr)


def _embed_dropout_kernel(seed_ref, ids_ref, table_ref, out_ref, *,
                          tb, V, E, dropout_p, training, use_onehot):
    """seed_ref: SMEM (1,) int32; ids_ref: (tb, 1) int32 VMEM block;
    table_ref: full (V, E) VMEM table; out_ref: (tb, E) VMEM output tile."""
    ids_col = ids_ref[...]                                   # (tb, 1) int32

    if use_onehot:
        # Vectorized gather on the MXU: onehot (tb, V) @ table (V, E).
        vocab = lax.broadcasted_iota(jnp.int32, (tb, V), 1)
        onehot = (vocab == ids_col).astype(table_ref.dtype)
        emb = jnp.dot(onehot, table_ref[...],
                      preferred_element_type=jnp.float32,
                      precision=lax.Precision.HIGHEST)
    else:
        # Large vocab: vectorized dynamic gather on the VMEM-resident table.
        emb = jnp.take(table_ref[...], ids_col[:, 0], axis=0)
        emb = emb.astype(jnp.float32)

    if training and 0.0 < dropout_p < 1.0:
        # Counter-based hash PRNG keyed on (seed, global element index);
        # fused with the gather result before the single store.
        thr = min(int(round(dropout_p * 4294967296.0)), 4294967295)
        blk = pl.program_id(0)
        seed_u = seed_ref[0].astype(jnp.uint32)
        row = lax.broadcasted_iota(jnp.uint32, (tb, E), 0)
        col = lax.broadcasted_iota(jnp.uint32, (tb, E), 1)
        tok = jnp.uint32(tb) * blk.astype(jnp.uint32) + row   # global token idx
        x = tok * jnp.uint32(E) + col + seed_u * jnp.uint32(0x9E3779B9)
        keep = _splitmix32(x) >= jnp.uint32(thr)               # P(keep)=1-p
        scale = jnp.float32(1.0 / (1.0 - dropout_p))
        emb = jnp.where(keep, emb * scale, jnp.float32(0.0))
    elif training and dropout_p >= 1.0:
        emb = jnp.zeros_like(emb)

    out_ref[...] = emb.astype(out_ref.dtype)


def base_decoder_embed(ids, table, *, dropout_p=0.2, training=False, seed=0):
    """Equivalent of `self.in_dropout(self.word_embedding(ids))` in BaseDecoder."""
    B, T = ids.shape
    V, E = table.shape
    N = B * T

    itemsize = jnp.dtype(table.dtype).itemsize
    sub = {4: 8, 2: 16, 1: 32}.get(itemsize, 8)     # sublane packing multiple
    tb = min(MAX_TOKENS_PER_BLOCK, _round_up(N, sub))
    n_pad = _round_up(N, tb)
    n_blocks = n_pad // tb

    # Clamp ids so an out-of-range token can never read past the table.
    ids_flat = jnp.clip(ids.reshape(-1).astype(jnp.int32), 0, V - 1)
    ids2d = jnp.zeros((n_pad, 1), jnp.int32).at[:N, 0].set(ids_flat)
    seed_arr = jnp.asarray([seed], jnp.int32)

    use_onehot = V <= ONE_HOT_MAX_VOCAB

    kernel = functools.partial(
        _embed_dropout_kernel, tb=tb, V=V, E=E,
        dropout_p=float(dropout_p), training=bool(training),
        use_onehot=use_onehot)

    # table (double-buffered by default) + output/id tiles + slack.
    vmem_bytes = 2 * V * E * itemsize + 4 * tb * E * 4 + 4 * tb * 4 + (4 << 20)
    vmem_bytes = int(min(max(vmem_bytes, 8 << 20), 64 << 20))

    out = pl.pallas_call(
        kernel,
        out_shape=jax.ShapeDtypeStruct((n_pad, E), table.dtype),
        grid_spec=pltpu.PrefetchScalarGridSpec(
            num_scalar_prefetch=1,                       # seed -> SMEM
            grid=(n_blocks,),
            in_specs=[
                # per-step token ids (tb, 1)
                pl.BlockSpec((tb, 1), lambda i, seed_s: (i, 0)),
                # full embedding table resident in VMEM (constant block index)
                pl.BlockSpec((V, E), lambda i, seed_s: (0, 0)),
            ],
            out_specs=pl.BlockSpec((tb, E), lambda i, seed_s: (i, 0)),
        ),
        compiler_params=pltpu.CompilerParams(
            dimension_semantics=("parallel",),           # independent tiles
            vmem_limit_bytes=vmem_bytes),
    )(seed_arr, ids2d, table)

    if n_pad != N:
        out = out[:N]
    return out.reshape(B, T, E)


if __name__ == "__main__":
    # Small shapes consistent with the module: emb_dim=128, vocab_size=64,
    # batch=2, seq=8.  (fc_emb_dim / attn_emb_dim are unused by the defined
    # submodules.)
    vocab_size, emb_dim = 64, 128
    B, T = 2, 8
    dropout_p = 0.2
    seed = 123

    key = jax.random.PRNGKey(0)
    k_table, k_ids = jax.random.split(key)

    # deterministic synthetic parameters (like nn.Embedding default init)
    word_embedding = jax.random.normal(k_table, (vocab_size, emb_dim),
                                       dtype=jnp.float32)
    ids = jax.random.randint(k_ids, (B, T), 0, vocab_size, dtype=jnp.int32)

    ref = jnp.take(word_embedding, ids.reshape(-1), axis=0).reshape(B, T, emb_dim)

    # eval mode (dropout = identity): must match the pure-JAX reference
    out_eval = base_decoder_embed(ids, word_embedding,
                                  dropout_p=dropout_p, training=False)
    out_eval = jax.block_until_ready(out_eval)
    assert out_eval.shape == (B, T, emb_dim)
    assert jnp.allclose(out_eval, ref, atol=1e-5, rtol=1e-5), "embedding mismatch"

    # training mode (inverted dropout fused in-kernel); compare against the
    # host-side replica of the in-kernel hash mask.
    out_train = base_decoder_embed(ids, word_embedding,
                                   dropout_p=dropout_p, training=True, seed=seed)
    out_train = jax.block_until_ready(out_train)
    assert out_train.shape == (B, T, emb_dim)

    keep = _keep_mask_host(B * T, emb_dim, seed, dropout_p).reshape(B, T, emb_dim)
    scale = jnp.float32(1.0 / (1.0 - dropout_p))
    expected = jnp.where(keep, ref * scale, jnp.float32(0.0))
    assert jnp.allclose(out_train, expected, atol=1e-5, rtol=1e-5), \
        "dropout mask/scaling mismatch"
    # sanity: drop rate roughly p
    drop_frac = float(jnp.mean((~keep).astype(jnp.float32)))
    assert 0.05 < drop_frac < 0.4, "implausible dropout rate"

    print("KERNEL_OK")
</pallas_src>

<mosaic_0001>
module attributes {stable_mosaic.version = 11 : i64} {
  func.func @_embed_dropout_kernel(%arg0: i32, %arg1: memref<1xi32, #tpu.memory_space<smem>>, %arg2: memref<16x1xi32, #tpu.memory_space<vmem>>, %arg3: memref<64x128xf32, #tpu.memory_space<vmem>>, %arg4: memref<16x128xf32, #tpu.memory_space<vmem>>) attributes {dimension_semantics = [#tpu.dimension_semantics<parallel>], iteration_bounds = array<i64: 1>, scalar_prefetch = 1 : i64, scratch_operands = 0 : i64, tpu.core_type = #tpu.core_type<tc>, window_params = [{transform_indices = @transform_0, window_bounds = array<i64: 16, 1>}, {pipeline_mode = #tpu.pipeline_mode<synchronous>, transform_indices = @transform_1, window_bounds = array<i64: 64, 128>}, {transform_indices = @transform_2, window_bounds = array<i64: 16, 128>}]} {
    %c0 = arith.constant 0 : index
    %c0_0 = arith.constant 0 : index
    %0 = vector.load %arg2[%c0, %c0_0] : memref<16x1xi32, #tpu.memory_space<vmem>>, vector<16x1xi32>
    %1 = tpu.iota {dimensions = array<i32: 1>} : vector<16x64xi32>
    %2 = vector.broadcast %0 : vector<16x1xi32> to vector<16x64xi32>
    %3 = arith.cmpi eq, %1, %2 : vector<16x64xi32>
    %4 = arith.extui %3 : vector<16x64xi1> to vector<16x64xi32>
    %5 = arith.sitofp %4 : vector<16x64xi32> to vector<16x64xf32>
    %c0_1 = arith.constant 0 : index
    %c0_2 = arith.constant 0 : index
    %6 = vector.load %arg3[%c0_1, %c0_2] : memref<64x128xf32, #tpu.memory_space<vmem>>, vector<64x128xf32>
    %cst = arith.constant dense<0.000000e+00> : vector<16x128xf32>
    %7 = tpu.matmul %5, %6, %cst {dimension_numbers = #tpu.dot_dimension_numbers<[1], [0], [0], [1], [0, 0, 1, 1], [], []>, precision = #tpu.contract_precision<fp32>} : vector<16x64xf32>, vector<64x128xf32>, vector<16x128xf32> -> vector<16x128xf32>
    %c0_3 = arith.constant 0 : index
    %c0_4 = arith.constant 0 : index
    %8 = vector.load %arg4[%c0_3, %c0_4] : memref<16x128xf32, #tpu.memory_space<vmem>>, vector<16x128xf32>
    tpu.vector_store %arg4[%c0_3, %c0_4], %7 {strides = array<i32>} : memref<16x128xf32, #tpu.memory_space<vmem>>, vector<16x128xf32>,
    return
  }
  func.func @transform_0(%arg0: i32, %arg1: memref<1xi32, #tpu.memory_space<smem>>) -> (i32, i32) {
    %c0_i32 = arith.constant 0 : i32
    %c0_i32_0 = arith.constant 0 : i32
    return %arg0, %c0_i32 : i32, i32
  }
  func.func @transform_1(%arg0: i32, %arg1: memref<1xi32, #tpu.memory_space<smem>>) -> (i32, i32) {
    %c0_i32 = arith.constant 0 : i32
    %c0_i32_0 = arith.constant 0 : i32
    %c0_i32_1 = arith.constant 0 : i32
    return %c0_i32, %c0_i32_0 : i32, i32
  }
  func.func @transform_2(%arg0: i32, %arg1: memref<1xi32, #tpu.memory_space<smem>>) -> (i32, i32) {
    %c0_i32 = arith.constant 0 : i32
    %c0_i32_0 = arith.constant 0 : i32
    return %arg0, %c0_i32 : i32, i32
  }
}

</mosaic_0001>

<bundles_post_ra>
// kernel: tpu_custom_call.1
= control target key start
LH: loop header
LB: loop body
LE: loop exit
PB: predicated region body
PF: predicated region fallthrough
CT: control target
= control target key end

     0   :  { %9 = vsyncpa [#allocation5], 0  ;;  %s1107_s0 = inlined_call_operand.<no memory space> [shape: s32[1], index: 0, kind: input, shape index: {}]   ;;  %s1108_s1 = inlined_call_operand.vmem [shape: s32[16,1], index: 1, kind: input, shape index: {}]   ;;  %s1109_s2 = inlined_call_operand.hbm [shape: f32[64,128], index: 2, kind: input, shape index: {}]   ;;  %s1110_s3 = inlined_call_operand.hbm [shape: f32[16,128], index: 3, kind: output, shape index: {}]  }
   0x1   :  { %10 = vsyncpa [#allocation6], 0  ;;  %s1001_s12 = smov [#allocation4]   ;;  %s953_s16 = scalar_lea.hbm %s1109_s2, 1024 }
   0x2   :  { %s18_s13 = sshll.u32 %s1001_s12, 4  ;;  %p954_p0 = scmp.ne.s32.totalorder %s1109_s2, %s953_s16  ;;  %s19_s13 = int_to_ptr.vmem [resolvable:$true] %s18_s13 }
   0x3   :  { %p957_p1 = scmp.lt.u32.totalorder %s953_s16, %s1109_s2 }
   0x5   :  { %p959_p2 = pnand %p957_p1, %p954_p0 }
   0x7   :  { %962 = shalt.err (!%p959_p2)
}
   0x8   :  { %s963_s20 = scalar_lea.vmem %s19_s13, 1024  ;;  %p968_p4 = scmp.lt.s32.totalorder %s19_s13, %s19_s13 }
   0x9   :  { %p964_p3 = scmp.ne.s32.totalorder %s19_s13, %s963_s20  ;;  %p969_p5 = scmp.lt.s32.totalorder %s963_s20, %s963_s20 }
   0xb   :  { %p970_p6 = por %p969_p5, %p968_p4 }
   0xd   :  { %p971_p7 = pnand %p970_p6, %p964_p3 }
   0xf   :  { %974 = shalt.err (!%p971_p7)
}
  0x10   :  { %s1002_s21 = smov 128   ;;  %s1003_s22 = smov 8  }
  0x11   :  { %24 = dma.hbm_to_vmem [thread:$0]  %s1109_s2, 1024, %s19_s13, [#allocation5], %s1002_s21, %s1002_s21, %s1003_s22  }
  0x12   :  { %997 = dma.done.wait [#allocation5], 1024  }
  0x13   :  { %998 = vsyncadd [#allocation5], 4294966272  ;;  %v1004_v0 = vmov 0   ;;  %v28_v1 = vld [vmem:[%s1108_s1] sm:$0xff]  ;;  %v45_v3 = vld [vmem:[#allocation4 + $0x8] sm:$0xff]  ;;  %vm52_vm0 = vcmask 523264  }
  0x14   :  { %952 = vset.pattern.permute.xlu0 %v1004_v0  ;;  %v44_v2 = vld [vmem:[#allocation4] sm:$0xff]  ;;  %v46_v5 = vld [vmem:[#allocation4 + $0x10] sm:$0xff]  ;;  %v47_v6 = vld [vmem:[#allocation4 + $0x18] sm:$0xff]  ;;  %v63_v8 = vand.u32 4294901760, %v45_v3 }
  0x15   :  { %33 = vperm.xlu0 %952, %v28_v1   ;;  %v60_v4 = vand.u32 4294901760, %v44_v2  ;;  %v29_v7 = vld [vmem:[%s1108_s1 + $0x8] sm:$0xff]  ;;  %v66_v9 = vand.u32 4294901760, %v46_v5  ;;  %v69_v10 = vand.u32 4294901760, %v47_v6  ;;  %v48_v11 = vld [vmem:[#allocation4 + $0x20] sm:$0xff]  ;;  %v50_v17 = vld [vmem:[#allocation4 + $0x30] sm:$0xff] }
  0x16   :  { %v49_v12 = vld [vmem:[#allocation4 + $0x28] sm:$0xff]  ;;  %v72_v15 = vand.u32 4294901760, %v48_v11  ;;  %v51_v18 = vld [vmem:[#allocation4 + $0x38] sm:$0xff]  ;;  %v161_v20 = vsub.f32 %v45_v3, %v63_v8  ;;  %v78_v21 = vand.u32 4294901760, %v50_v17  ;;  %v30_v3 = vlaneseq  ;;  %s1006_s1 = smov [#allocation7]  }
  0x17   :  { %v1048_v13 = vpack.c.bf16 %v63_v8, %v60_v4  ;;  %v1050_v14 = vpack.c.bf16 %v69_v10, %v66_v9  ;;  %v75_v16 = vand.u32 4294901760, %v49_v12  ;;  %v154_v19 = vsub.f32 %v44_v2, %v60_v4  ;;  %s646_s2 = sshll.u32 %s1006_s1, 4  ;;  %s647_s2 = int_to_ptr.vmem [resolvable:$true] %s646_s2 }
  0x18   :  { %v81_v22 = vand.u32 4294901760, %v51_v18  ;;  %v162_v24 = vand.u32 4294901760, %v161_v20  ;;  %v168_v28 = vsub.f32 %v46_v5, %v66_v9  ;;  %v175_v29 = vsub.f32 %v47_v6, %v69_v10  ;;  %s975_s29 = scalar_lea.vmem %s647_s2, 256  ;;  %p980_p9 = scmp.lt.s32.totalorder %s647_s2, %s647_s2 }
  0x19   :  { %36 = vperm.xlu0 %952, %v29_v7   ;;  %889 = vmatprep.subr.bf16.mxu0 %v1048_v13  ;;  %v155_v23 = vand.u32 4294901760, %v154_v19  ;;  %v1058_v25 = vpack.c.bf16 %v75_v16, %v72_v15  ;;  %v182_v38 = vsub.f32 %v48_v11, %v72_v15  ;;  %v189_v39 = vsub.f32 %v49_v12, %v75_v16  ;;  %p976_p8 = scmp.ne.s32.totalorder %s647_s2, %s975_s29  ;;  %p981_p10 = scmp.lt.s32.totalorder %s975_s29, %s975_s29 }
  0x1a   :  { %841 = vmatprep.subr.bf16.mxu1 %v1048_v13  ;;  %891 = vmatpush3.bf16.msra.mxu0 %v1048_v13  ;;  %v163_v27 = vsub.f32 %v161_v20, %v162_v24  ;;  %v1062_v30 = vpack.c.bf16 %v81_v22, %v78_v21  ;;  %v169_v33 = vand.u32 4294901760, %v168_v28  ;;  %v176_v34 = vand.u32 4294901760, %v175_v29 }
  0x1b   :  { %843 = vmatpush3.bf16.msra.mxu1 %v1048_v13  ;;  %893 = vmatprep.subr.bf16.mxu0 %v1050_v14  ;;  %v156_v26 = vsub.f32 %v154_v19, %v155_v23  ;;  %v904_v40 = vpack.c.bf16 %v162_v24, %v155_v23  ;;  %v183_v44 = vand.u32 4294901760, %v182_v38  ;;  %v190_v45 = vand.u32 4294901760, %v189_v39  ;;  %p982_p11 = por %p981_p10, %p980_p9 }
  0x1c   :  { %845 = vmatprep.subr.bf16.mxu1 %v1050_v14  ;;  %v164_v32 = vand.u32 4294901760, %v163_v27  ;;  %v1066_v35 = vpack.c.bf16 %v176_v34, %v169_v33  ;;  %v170_v36 = vsub.f32 %v168_v28, %v169_v33  ;;  %v177_v37 = vsub.f32 %v175_v29, %v176_v34 }
  0x1d   :  { %v157_v31 = vand.u32 4294901760, %v156_v26  ;;  %v196_v47 = vsub.f32 %v50_v17, %v78_v21  ;;  %v203_v48 = vsub.f32 %v51_v18, %v81_v22  ;;  %v912_v49 = vpack.c.bf16 %v190_v45, %v183_v44  ;;  %p983_p12 = pnand %p982_p11, %p976_p8 }
  0x1e   :  { %895 = vmatpush3.bf16.msra.mxu0 %v1050_v14  ;;  %v171_v42 = vand.u32 4294901760, %v170_v36  ;;  %v178_v43 = vand.u32 4294901760, %v177_v37  ;;  %v184_v50 = vsub.f32 %v182_v38, %v183_v44  ;;  %v191_v51 = vsub.f32 %v189_v39, %v190_v45 }
  0x1f   :  { %847 = vmatpush3.bf16.msra.mxu1 %v1050_v14  ;;  %897 = vmatprep.subr.bf16.mxu0 %v1058_v25  ;;  %v856_v41 = vpack.c.bf16 %v164_v32, %v157_v31  ;;  %v197_v52 = vand.u32 4294901760, %v196_v47  ;;  %v204_v53 = vand.u32 4294901760, %v203_v48  ;;  %v872_v63 = vpack.c.bf16 %v161_v20, %v154_v19 }
  0x20   :  { %849 = vmatprep.subr.bf16.mxu1 %v1058_v25  ;;  %v860_v46 = vpack.c.bf16 %v178_v43, %v171_v42  ;;  %v185_v54 = vand.u32 4294901760, %v184_v50  ;;  %v192_v55 = vand.u32 4294901760, %v191_v51  ;;  %v876_v0 = vpack.c.bf16 %v175_v29, %v168_v28 }
  0x21   :  { %v916_v56 = vpack.c.bf16 %v204_v53, %v197_v52  ;;  %v198_v57 = vsub.f32 %v196_v47, %v197_v52  ;;  %v205_v58 = vsub.f32 %v203_v48, %v204_v53  ;;  %v880_v1 = vpack.c.bf16 %v189_v39, %v182_v38 }
  0x22   :  { %899 = vmatpush3.bf16.msra.mxu0 %v1058_v25  ;;  %v864_v59 = vpack.c.bf16 %v192_v55, %v185_v54  ;;  %v884_v2 = vpack.c.bf16 %v203_v48, %v196_v47  ;;  %v31_v4 = vand.u32 127, %v30_v3  ;;  %v1005_v6 = vmov 0.0  }
  0x23   :  { %851 = vmatpush3.bf16.msra.mxu1 %v1058_v25  ;;  %901 = vmatprep.subr.bf16.mxu0 %v1062_v30  ;;  %v199_v60 = vand.u32 4294901760, %v198_v57  ;;  %v206_v61 = vand.u32 4294901760, %v205_v58 }
  0x24   :  { %853 = vmatprep.subr.bf16.mxu1 %v1062_v30 }
  0x25   :  { %v868_v62 = vpack.c.bf16 %v206_v61, %v199_v60 }
  0x26   :  { %903 = vmatpush3.bf16.msra.mxu0 %v1062_v30 }
  0x27   :  { %855 = vmatpush3.bf16.msra.mxu1 %v1062_v30  ;;  %905 = vmatprep.subr.bf16.mxu0 %v904_v40 }
  0x28   :  { %857 = vmatprep.subr.bf16.mxu1 %v856_v41 }
  0x94   :  { %v34_v5 = vpop.permute.xlu0 %33 }
  0x95   :  { %vm38_vm1 = vcmp.eq.s32.totalorder %v31_v4, %v34_v5 }
  0x96   :  { %v658_v7 = vsel %vm38_vm1, 1.0, %v1005_v6 }
  0x97   :  { %v54_v8 = vsel %vm52_vm0, %v658_v7, 0 }
  0x98   :  { %v133_v9 = vsub.f32 %v54_v8, %v54_v8  ;;  %v37_v10 = vpop.permute.xlu0 %36 }
  0x99   :  { %vm39_vm2 = vcmp.eq.s32.totalorder %v31_v4, %v37_v10 }
  0x9a   :  { %v659_v11 = vsel %vm39_vm2, 1.0, %v1005_v6  ;;  %v134_v12 = vand.u32 4294901760, %v133_v9 }
  0x9b   :  { %v57_v15 = vsel %vm52_vm0, %v659_v11, 0 }
  0x9c   :  { %v143_v16 = vsub.f32 %v57_v15, %v57_v15  ;;  %799 = vmatprep.mubr.f32.mxu0 %v134_v12  ;;  %v135_v17 = vsub.f32 %v133_v9, %v134_v12 }
  0x9e   :  { %v136_v18 = vand.u32 4294901760, %v135_v17  ;;  %v144_v19 = vand.u32 4294901760, %v143_v16 }
  0xa0   :  { %742 = vmatprep.mubr.f32.mxu1 %v136_v18  ;;  %800 = vmatmul.mubr.f32.vlgmr.msra.gmra.mrb[0].mxu0 %v144_v19  ;;  %v145_v20 = vsub.f32 %v143_v16, %v144_v19 }
  0xa1   :  { %907 = vmatpush3.bf16.msra.mxu0 %v904_v40  ;;  %818 = vmatprep.mubr.msk.f32.mxu0 %vm52_vm0, %v658_v7 }
  0xa2   :  { %909 = vmatprep.subr.bf16.mxu0 %v1066_v35  ;;  %v146_v21 = vand.u32 4294901760, %v145_v20 }
  0xa4   :  { %743 = vmatmul.mubr.f32.vlgmr.msra.gmra.mrb[0].mxu1 %v146_v21 }
  0xa5   :  { %859 = vmatpush3.bf16.msra.mxu1 %v856_v41  ;;  %911 = vmatpush3.bf16.msra.mxu0 %v1066_v35 }
  0xa6   :  { %761 = vmatprep.mubr.msk.f32.mxu1 %vm52_vm0, %v658_v7  ;;  %861 = vmatprep.subr.bf16.mxu1 %v860_v46 }
  0xa7   :  { %913 = vmatprep.subr.bf16.mxu0 %v912_v49 }
  0xa9   :  { %863 = vmatpush3.bf16.msra.mxu1 %v860_v46  ;;  %915 = vmatpush3.bf16.msra.mxu0 %v912_v49 }
  0xaa   :  { %865 = vmatprep.subr.bf16.mxu1 %v864_v59  ;;  %917 = vmatprep.subr.bf16.mxu0 %v916_v56 }
  0xad   :  { %867 = vmatpush3.bf16.msra.mxu1 %v864_v59  ;;  %919 = vmatpush3.bf16.msra.mxu0 %v916_v56 }
  0xae   :  { %869 = vmatprep.subr.bf16.mxu1 %v868_v62  ;;  %921 = vmatprep.subr.bf16.mxu0 %v1048_v13 }
  0xb0   :  { %819 = vmatmul.mubr.msk.f32.vlgmr.msra.gmra.mrb[0].mxu0 %vm52_vm0, %v659_v11 }
  0xb1   :  { %871 = vmatpush3.bf16.msra.mxu1 %v868_v62  ;;  %923 = vmatpush3.bf16.msra.mxu0 %v1048_v13 }
  0xb2   :  { %837 = vmatprep.mubr.msk.f32.mxu0 %vm52_vm0, %v658_v7  ;;  %873 = vmatprep.subr.bf16.mxu1 %v872_v63 }
  0xb3   :  { %925 = vmatprep.subr.bf16.mxu0 %v1050_v14 }
  0xb4   :  { %762 = vmatmul.mubr.msk.f32.vlgmr.msra.gmra.mrb[0].mxu1 %vm52_vm0, %v659_v11 }
  0xb5   :  { %875 = vmatpush3.bf16.msra.mxu1 %v872_v63  ;;  %780 = vmatprep.mubr.f32.mxu1 %v133_v9 }
  0xb6   :  { %927 = vmatpush3.bf16.msra.mxu0 %v1050_v14  ;;  %877 = vmatprep.subr.bf16.mxu1 %v876_v0 }
  0xb7   :  { %929 = vmatprep.subr.bf16.mxu0 %v1058_v25 }
  0xb9   :  { %879 = vmatpush3.bf16.msra.mxu1 %v876_v0 }
  0xba   :  { %931 = vmatpush3.bf16.msra.mxu0 %v1058_v25  ;;  %881 = vmatprep.subr.bf16.mxu1 %v880_v1 }
  0xbb   :  { %933 = vmatprep.subr.bf16.mxu0 %v1062_v30 }
  0xbd   :  { %883 = vmatpush3.bf16.msra.mxu1 %v880_v1 }
  0xbe   :  { %935 = vmatpush3.bf16.msra.mxu0 %v1062_v30  ;;  %885 = vmatprep.subr.bf16.mxu1 %v884_v2 }
  0xc1   :  { %838 = vmatmul.mubr.msk.f32.vlgmr.msra.gmra.mrb[0].mxu0 %vm52_vm0, %v659_v11  ;;  %887 = vmatpush3.bf16.msra.mxu1 %v884_v2 }
  0xc4   :  { %781 = vmatmul.mubr.f32.vlgmr.msra.gmra.mrb[0].mxu1 %v143_v16 }
 0x194   :  { %v839_v13 = vpop.f32.mrb[0].mxu0 }
 0x195   :  { %v629_v22 = vpop.f32.mrb[1].mxu0 }
 0x197   :  { %v782_v14 = vpop.f32.mrb[0].mxu1 }
 0x198   :  { %v936_v23 = vadd.f32 %v839_v13, %v782_v14  ;;  %v353_v24 = vpop.f32.mrb[1].mxu1 }
 0x199   :  { %v937_v26 = vadd.f32 %v629_v22, %v353_v24 }
 0x19a   :  { %640 = vst [vmem:[#allocation7 + $0x8] sm:$0xff] %v936_v23 }
 0x19b   :  { %639 = vst [vmem:[#allocation7] sm:$0xff] %v937_v26 }
 0x19c   :  { %986 = shalt.err (!%p983_p12)
}
 0x19d   :  { %s987_s5 = scalar_lea.hbm %s1110_s3, 256 }
 0x19e   :  { %p988_p13 = scmp.ne.s32.totalorder %s1110_s3, %s987_s5  ;;  %p991_p0 = scmp.lt.u32.totalorder %s987_s5, %s1110_s3 }
 0x1a0   :  { %p993_p1 = pnand %p991_p0, %p988_p13 }
 0x1a2   :  { %996 = shalt.err (!%p993_p1)
}
 0x1a3   :  { %652 = dma.vmem_to_hbm [thread:$0]  %s647_s2, 256, %s1110_s3, [#allocation6], %s1002_s21, %s1002_s21, %s1003_s22  }
 0x1a4   :  { %999 = dma.done.wait [#allocation6], 256  }
 0x1a5   :  { %1000 = vsyncadd [#allocation6], 4294967040 }
 0x1a6   :  { %656 = vsyncpa [#allocation5], 1 }
 0x1a7   :  { %657 = vsyncpa [#allocation6], 1 }

</bundles_post_ra>
